<compile_context>
chip_gen: v7x
topology: tpu7x:2x2x1
jax: 0.10.0
libtpu: 0.0.40
codegen_flags: <defaults>
</compile_context>

<pallas_src>
import jax
import jax.numpy as jnp
from jax.experimental import pallas as pl
from jax.experimental.pallas import tpu as pltpu

Y_DIM = 24  # fixed by the module: fc2 input is concat([tmp, y]) with y having 24 feats


def classifier_kernel(x_ref, y_ref,
                      w1_ref, b1_ref,
                      w2a_ref, w2b_ref, b2_ref,
                      wo_ref, bo_ref,
                      o_ref):
    # dropout == identity (inference mode)
    x = x_ref[...]          # (tile_B, H_in)  bf16
    y = y_ref[...]          # (tile_B, 24)    bf16

    # fc1 + ReLU: bf16 MXU operands, f32 accumulate, f32 VPU math.
    tmp = jnp.dot(x, w1_ref[...], preferred_element_type=jnp.float32) + b1_ref[...]
    tmp = jnp.maximum(tmp, 0.0)

    # fc2 on concat([tmp, y]) == tmp @ W2a + y @ W2b (algebraically exact), then ReLU.
    h = (jnp.dot(tmp.astype(jnp.bfloat16), w2a_ref[...],
                 preferred_element_type=jnp.float32)
         + jnp.dot(y, w2b_ref[...], preferred_element_type=jnp.float32)
         + b2_ref[...])
    h = jnp.maximum(h, 0.0)

    # output linear
    o = jnp.dot(h.astype(jnp.bfloat16), wo_ref[...],
                preferred_element_type=jnp.float32) + bo_ref[...]
    o_ref[...] = o.astype(o_ref.dtype)


def pack_params(params):
    """One-time weight packing: transpose to (in, out), split W2 at the concat
    boundary, reshape biases to (1, N), cast matmul operands to bf16."""
    hidden_dim = params["w1"].shape[0]
    return {
        "w1t": params["w1"].T.astype(jnp.bfloat16),                  # (H_in, H)
        "w2a": params["w2"][:, :hidden_dim].T.astype(jnp.bfloat16),  # (H, H)
        "w2b": params["w2"][:, hidden_dim:].T.astype(jnp.bfloat16),  # (24, H)
        "wot": params["wo"].T.astype(jnp.bfloat16),                  # (H, out)
        "b1": params["b1"].reshape(1, -1).astype(jnp.float32),
        "b2": params["b2"].reshape(1, -1).astype(jnp.float32),
        "bo": params["bo"].reshape(1, -1).astype(jnp.float32),
    }


def classifier_binary_forward(x, y, packed):
    """x: (B, hidden_state_size) f32/bf16, y: (B, 24) -> (B, output_dim) f32."""
    B, h_in = x.shape
    hidden_dim = packed["w1t"].shape[1]
    output_dim = packed["wot"].shape[1]

    # Batch tile: multiple of 8 sublanes, capped at 512 rows per grid step
    # (comfortably inside the 16/32 MiB scoped-VMEM default on all generations
    # with double-buffered x/y tiles + resident weights).
    tile_b = min(512, ((B + 7) // 8) * 8)
    b_pad = ((B + tile_b - 1) // tile_b) * tile_b
    grid = (b_pad // tile_b,)

    xb = x.astype(jnp.bfloat16)
    yb = y.astype(jnp.bfloat16)
    if b_pad != B:
        xb = jnp.pad(xb, ((0, b_pad - B), (0, 0)))
        yb = jnp.pad(yb, ((0, b_pad - B), (0, 0)))

    def batch_spec(feat):
        return pl.BlockSpec((tile_b, feat), lambda i: (i, 0))

    def const_spec(arr):
        return pl.BlockSpec(arr.shape, lambda i: (0, 0))

    flops = 2 * b_pad * (h_in * hidden_dim
                         + (hidden_dim + Y_DIM) * hidden_dim
                         + hidden_dim * output_dim)
    bytes_accessed = (xb.size * xb.dtype.itemsize
                      + yb.size * yb.dtype.itemsize
                      + sum(int(v.size) * v.dtype.itemsize for v in packed.values())
                      + b_pad * output_dim * 4)

    out = pl.pallas_call(
        classifier_kernel,
        out_shape=jax.ShapeDtypeStruct((b_pad, output_dim), jnp.float32),
        grid_spec=pltpu.PrefetchScalarGridSpec(
            num_scalar_prefetch=0,
            grid=grid,
            in_specs=[
                batch_spec(h_in),            # x tile
                batch_spec(Y_DIM),           # y tile
                const_spec(packed["w1t"]),   # weights/biases: VMEM-resident
                const_spec(packed["b1"]),
                const_spec(packed["w2a"]),
                const_spec(packed["w2b"]),
                const_spec(packed["b2"]),
                const_spec(packed["wot"]),
                const_spec(packed["bo"]),
            ],
            out_specs=pl.BlockSpec((tile_b, output_dim), lambda i: (i, 0)),
        ),
        compiler_params=pltpu.CompilerParams(
            dimension_semantics=("parallel",)),
        cost_estimate=pl.CostEstimate(
            flops=flops, transcendentals=0, bytes_accessed=bytes_accessed),
    )(xb, yb,
      packed["w1t"], packed["b1"],
      packed["w2a"], packed["w2b"], packed["b2"],
      packed["wot"], packed["bo"])

    return out[:B] if b_pad != B else out


def init_params(key, hidden_state_size, hidden_dim, output_dim):
    """Deterministic PyTorch-style (uniform +-1/sqrt(fan_in)) init."""
    ks = jax.random.split(key, 6)

    def lin(kw, kb, fan_in, fan_out):
        bound = 1.0 / jnp.sqrt(fan_in)
        w = jax.random.uniform(kw, (fan_out, fan_in), jnp.float32, -bound, bound)
        b = jax.random.uniform(kb, (fan_out,), jnp.float32, -bound, bound)
        return w, b

    w1, b1 = lin(ks[0], ks[1], hidden_state_size, hidden_dim)
    w2, b2 = lin(ks[2], ks[3], hidden_dim + Y_DIM, hidden_dim)
    wo, bo = lin(ks[4], ks[5], hidden_dim, output_dim)
    return {"w1": w1, "b1": b1, "w2": w2, "b2": b2, "wo": wo, "bo": bo}


def reference_forward(x, y, p):
    tmp = jax.nn.relu(x @ p["w1"].T + p["b1"])
    cat = jnp.concatenate([tmp, y], axis=1)
    h = jax.nn.relu(cat @ p["w2"].T + p["b2"])
    return h @ p["wo"].T + p["bo"]


if __name__ == "__main__":
    hidden_state_size = 32
    hidden_dim = 32
    output_dim = 2

    key = jax.random.PRNGKey(0)
    k_x, k_y, k_p = jax.random.split(key, 3)
    params = init_params(k_p, hidden_state_size, hidden_dim, output_dim)
    packed = pack_params(params)

    fwd = jax.jit(classifier_binary_forward)

    # Small batch (single grid step).
    batch = 8
    x = jax.random.normal(k_x, (batch, hidden_state_size), jnp.float32)
    y = jax.random.normal(k_y, (batch, Y_DIM), jnp.float32)
    out = jax.block_until_ready(fwd(x, y, packed))
    ref = reference_forward(x, y, params)
    assert out.shape == (batch, output_dim)
    assert jnp.allclose(out, ref, atol=5e-2, rtol=5e-2)

    # Larger batch: exercises multi-step grid, batch padding and slicing.
    batch2 = 1030
    x2 = jax.random.normal(k_x, (batch2, hidden_state_size), jnp.float32)
    y2 = jax.random.normal(k_y, (batch2, Y_DIM), jnp.float32)
    out2 = jax.block_until_ready(fwd(x2, y2, packed))
    ref2 = reference_forward(x2, y2, params)
    assert out2.shape == (batch2, output_dim)
    assert jnp.allclose(out2, ref2, atol=5e-2, rtol=5e-2)

    print("KERNEL_OK")
</pallas_src>

<mosaic_0001>
module attributes {stable_mosaic.version = 11 : i64} {
  func.func @classifier_kernel(%arg0: i32, %arg1: memref<8x32xbf16, #tpu.memory_space<vmem>>, %arg2: memref<8x24xbf16, #tpu.memory_space<vmem>>, %arg3: memref<32x32xbf16, #tpu.memory_space<vmem>>, %arg4: memref<1x32xf32, #tpu.memory_space<vmem>>, %arg5: memref<32x32xbf16, #tpu.memory_space<vmem>>, %arg6: memref<24x32xbf16, #tpu.memory_space<vmem>>, %arg7: memref<1x32xf32, #tpu.memory_space<vmem>>, %arg8: memref<32x2xbf16, #tpu.memory_space<vmem>>, %arg9: memref<1x2xf32, #tpu.memory_space<vmem>>, %arg10: memref<8x2xf32, #tpu.memory_space<vmem>>) attributes {dimension_semantics = [#tpu.dimension_semantics<parallel>], iteration_bounds = array<i64: 1>, scalar_prefetch = 0 : i64, scratch_operands = 0 : i64, tpu.core_type = #tpu.core_type<tc>, window_params = [{transform_indices = @transform_0, window_bounds = array<i64: 8, 32>}, {transform_indices = @transform_1, window_bounds = array<i64: 8, 24>}, {pipeline_mode = #tpu.pipeline_mode<synchronous>, transform_indices = @transform_2, window_bounds = array<i64: 32, 32>}, {pipeline_mode = #tpu.pipeline_mode<synchronous>, transform_indices = @transform_3, window_bounds = array<i64: 1, 32>}, {pipeline_mode = #tpu.pipeline_mode<synchronous>, transform_indices = @transform_4, window_bounds = array<i64: 32, 32>}, {pipeline_mode = #tpu.pipeline_mode<synchronous>, transform_indices = @transform_5, window_bounds = array<i64: 24, 32>}, {pipeline_mode = #tpu.pipeline_mode<synchronous>, transform_indices = @transform_6, window_bounds = array<i64: 1, 32>}, {pipeline_mode = #tpu.pipeline_mode<synchronous>, transform_indices = @transform_7, window_bounds = array<i64: 32, 2>}, {pipeline_mode = #tpu.pipeline_mode<synchronous>, transform_indices = @transform_8, window_bounds = array<i64: 1, 2>}, {transform_indices = @transform_9, window_bounds = array<i64: 8, 2>}]} {
    %c0 = arith.constant 0 : index
    %c0_0 = arith.constant 0 : index
    %0 = vector.load %arg1[%c0, %c0_0] : memref<8x32xbf16, #tpu.memory_space<vmem>>, vector<8x32xbf16>
    %c0_1 = arith.constant 0 : index
    %c0_2 = arith.constant 0 : index
    %1 = vector.load %arg2[%c0_1, %c0_2] : memref<8x24xbf16, #tpu.memory_space<vmem>>, vector<8x24xbf16>
    %c0_3 = arith.constant 0 : index
    %c0_4 = arith.constant 0 : index
    %2 = vector.load %arg3[%c0_3, %c0_4] : memref<32x32xbf16, #tpu.memory_space<vmem>>, vector<32x32xbf16>
    %cst = arith.constant dense<0.000000e+00> : vector<8x32xf32>
    %3 = tpu.matmul %0, %2, %cst {dimension_numbers = #tpu.dot_dimension_numbers<[1], [0], [0], [1], [0, 0, 1, 1], [], []>} : vector<8x32xbf16>, vector<32x32xbf16>, vector<8x32xf32> -> vector<8x32xf32>
    %c0_5 = arith.constant 0 : index
    %c0_6 = arith.constant 0 : index
    %4 = vector.load %arg4[%c0_5, %c0_6] : memref<1x32xf32, #tpu.memory_space<vmem>>, vector<1x32xf32>
    %5 = vector.broadcast %4 : vector<1x32xf32> to vector<8x32xf32>
    %6 = arith.addf %3, %5 : vector<8x32xf32>
    %cst_7 = arith.constant 0.000000e+00 : f32
    %7 = vector.broadcast %cst_7 : f32 to vector<8x32xf32>
    %8 = arith.maximumf %6, %7 : vector<8x32xf32>
    %9 = arith.truncf %8 : vector<8x32xf32> to vector<8x32xbf16>
    %c0_8 = arith.constant 0 : index
    %c0_9 = arith.constant 0 : index
    %10 = vector.load %arg5[%c0_8, %c0_9] : memref<32x32xbf16, #tpu.memory_space<vmem>>, vector<32x32xbf16>
    %cst_10 = arith.constant dense<0.000000e+00> : vector<8x32xf32>
    %11 = tpu.matmul %9, %10, %cst_10 {dimension_numbers = #tpu.dot_dimension_numbers<[1], [0], [0], [1], [0, 0, 1, 1], [], []>} : vector<8x32xbf16>, vector<32x32xbf16>, vector<8x32xf32> -> vector<8x32xf32>
    %c0_11 = arith.constant 0 : index
    %c0_12 = arith.constant 0 : index
    %12 = vector.load %arg6[%c0_11, %c0_12] : memref<24x32xbf16, #tpu.memory_space<vmem>>, vector<24x32xbf16>
    %cst_13 = arith.constant dense<0.000000e+00> : vector<8x32xf32>
    %13 = tpu.matmul %1, %12, %cst_13 {dimension_numbers = #tpu.dot_dimension_numbers<[1], [0], [0], [1], [0, 0, 1, 1], [], []>} : vector<8x24xbf16>, vector<24x32xbf16>, vector<8x32xf32> -> vector<8x32xf32>
    %14 = arith.addf %11, %13 : vector<8x32xf32>
    %c0_14 = arith.constant 0 : index
    %c0_15 = arith.constant 0 : index
    %15 = vector.load %arg7[%c0_14, %c0_15] : memref<1x32xf32, #tpu.memory_space<vmem>>, vector<1x32xf32>
    %16 = vector.broadcast %15 : vector<1x32xf32> to vector<8x32xf32>
    %17 = arith.addf %14, %16 : vector<8x32xf32>
    %cst_16 = arith.constant 0.000000e+00 : f32
    %18 = vector.broadcast %cst_16 : f32 to vector<8x32xf32>
    %19 = arith.maximumf %17, %18 : vector<8x32xf32>
    %20 = arith.truncf %19 : vector<8x32xf32> to vector<8x32xbf16>
    %c0_17 = arith.constant 0 : index
    %c0_18 = arith.constant 0 : index
    %21 = vector.load %arg8[%c0_17, %c0_18] : memref<32x2xbf16, #tpu.memory_space<vmem>>, vector<32x2xbf16>
    %cst_19 = arith.constant dense<0.000000e+00> : vector<8x2xf32>
    %22 = tpu.matmul %20, %21, %cst_19 {dimension_numbers = #tpu.dot_dimension_numbers<[1], [0], [0], [1], [0, 0, 1, 1], [], []>} : vector<8x32xbf16>, vector<32x2xbf16>, vector<8x2xf32> -> vector<8x2xf32>
    %c0_20 = arith.constant 0 : index
    %c0_21 = arith.constant 0 : index
    %23 = vector.load %arg9[%c0_20, %c0_21] : memref<1x2xf32, #tpu.memory_space<vmem>>, vector<1x2xf32>
    %24 = vector.broadcast %23 : vector<1x2xf32> to vector<8x2xf32>
    %25 = arith.addf %22, %24 : vector<8x2xf32>
    %c0_22 = arith.constant 0 : index
    %c0_23 = arith.constant 0 : index
    %26 = vector.load %arg10[%c0_22, %c0_23] : memref<8x2xf32, #tpu.memory_space<vmem>>, vector<8x2xf32>
    tpu.vector_store %arg10[%c0_22, %c0_23], %25 {strides = array<i32>} : memref<8x2xf32, #tpu.memory_space<vmem>>, vector<8x2xf32>,
    return
  }
  func.func @transform_0(%arg0: i32) -> (i32, i32) {
    %c0_i32 = arith.constant 0 : i32
    %c0_i32_0 = arith.constant 0 : i32
    return %arg0, %c0_i32 : i32, i32
  }
  func.func @transform_1(%arg0: i32) -> (i32, i32) {
    %c0_i32 = arith.constant 0 : i32
    %c0_i32_0 = arith.constant 0 : i32
    return %arg0, %c0_i32 : i32, i32
  }
  func.func @transform_2(%arg0: i32) -> (i32, i32) {
    %c0_i32 = arith.constant 0 : i32
    %c0_i32_0 = arith.constant 0 : i32
    %c0_i32_1 = arith.constant 0 : i32
    return %c0_i32, %c0_i32_0 : i32, i32
  }
  func.func @transform_3(%arg0: i32) -> (i32, i32) {
    %c0_i32 = arith.constant 0 : i32
    %c0_i32_0 = arith.constant 0 : i32
    %c0_i32_1 = arith.constant 0 : i32
    return %c0_i32, %c0_i32_0 : i32, i32
  }
  func.func @transform_4(%arg0: i32) -> (i32, i32) {
    %c0_i32 = arith.constant 0 : i32
    %c0_i32_0 = arith.constant 0 : i32
    %c0_i32_1 = arith.constant 0 : i32
    return %c0_i32, %c0_i32_0 : i32, i32
  }
  func.func @transform_5(%arg0: i32) -> (i32, i32) {
    %c0_i32 = arith.constant 0 : i32
    %c0_i32_0 = arith.constant 0 : i32
    %c0_i32_1 = arith.constant 0 : i32
    return %c0_i32, %c0_i32_0 : i32, i32
  }
  func.func @transform_6(%arg0: i32) -> (i32, i32) {
    %c0_i32 = arith.constant 0 : i32
    %c0_i32_0 = arith.constant 0 : i32
    %c0_i32_1 = arith.constant 0 : i32
    return %c0_i32, %c0_i32_0 : i32, i32
  }
  func.func @transform_7(%arg0: i32) -> (i32, i32) {
    %c0_i32 = arith.constant 0 : i32
    %c0_i32_0 = arith.constant 0 : i32
    %c0_i32_1 = arith.constant 0 : i32
    return %c0_i32, %c0_i32_0 : i32, i32
  }
  func.func @transform_8(%arg0: i32) -> (i32, i32) {
    %c0_i32 = arith.constant 0 : i32
    %c0_i32_0 = arith.constant 0 : i32
    %c0_i32_1 = arith.constant 0 : i32
    return %c0_i32, %c0_i32_0 : i32, i32
  }
  func.func @transform_9(%arg0: i32) -> (i32, i32) {
    %c0_i32 = arith.constant 0 : i32
    %c0_i32_0 = arith.constant 0 : i32
    return %arg0, %c0_i32 : i32, i32
  }
}

</mosaic_0001>

<bundles_post_ra>
// kernel: classifier_binary_forward.1
= control target key start
LH: loop header
LB: loop body
LE: loop exit
PB: predicated region body
PF: predicated region fallthrough
CT: control target
= control target key end

     0   :  { %v374_v0 = vmov 0.0   ;;  %vm375_vm0 = vmmov 0   ;;  %vm58_vm1 = vcmask 261120   ;;  %vm124_vm2 = vcmask 1043456   ;;  %s475_s2 = inlined_call_operand.vmem [shape: bf16[32,32], index: 2, kind: input, shape index: {}]   ;;  %s476_s5 = inlined_call_operand.vmem [shape: bf16[24,32], index: 5, kind: input, shape index: {}]   ;;  %s477_s4 = inlined_call_operand.vmem [shape: bf16[32,32], index: 4, kind: input, shape index: {}]   ;;  %s478_s0 = inlined_call_operand.vmem [shape: bf16[8,32], index: 0, kind: input, shape index: {}]   ;;  %s479_s1 = inlined_call_operand.vmem [shape: bf16[8,24], index: 1, kind: input, shape index: {}]   ;;  %s480_s3 = inlined_call_operand.vmem [shape: f32[1,32], index: 3, kind: input, shape index: {}]   ;;  %s481_s7 = inlined_call_operand.vmem [shape: bf16[32,2], index: 7, kind: input, shape index: {}]   ;;  %s482_s6 = inlined_call_operand.vmem [shape: f32[1,32], index: 6, kind: input, shape index: {}]   ;;  %s483_s8 = inlined_call_operand.vmem [shape: f32[1,2], index: 8, kind: input, shape index: {}]   ;;  %s484_s9 = inlined_call_operand.vmem [shape: f32[8,2], index: 9, kind: output, shape index: {}]  }
   0x1   :  { %332 = vmatprep.subr.bf16.mxu0 %v374_v0  ;;  %v366_v1 = vld [vmem:[%s475_s2] sm:$0xff]   ;;  %336 = vmatprep.mubr.msk.bf16.mxu0 %vm375_vm0, %v374_v0  ;;  %v367_v2 = vld [vmem:[%s475_s2 + $0x8] sm:$0xff]   ;;  %vm120_vm3 = vcmask 195584   ;;  %vm299_vm4 = vcmask 15360  }
   0x2   :  { %340 = vmatprep.subr.bf16.mxu1 %v374_v0  ;;  %344 = vmatprep.mubr.msk.bf16.mxu1 %vm375_vm0, %v374_v0  ;;  %v368_v3 = vld [vmem:[%s476_s5] sm:$0xff]   ;;  %v370_v6 = vld [vmem:[%s476_s5 + $0x8] ss:$0 sps:$4 sm:$0xff]  }
   0x3   :  { %333 = vmatpush3.bf16.msra.mxu0 %v366_v1  ;;  %341 = vmatpush3.bf16.msra.mxu1 %v368_v3  ;;  %v33_v4 = vld [vmem:[%s478_s0] sm:$0xf]  ;;  %v126_v7 = vsel %vm124_vm2, %v370_v6, 0  ;;  %v371_v8 = vld [vmem:[%s477_s4 + $0x8] sm:$0xff]  }
   0x4   :  { %334 = vmatprep.subr.bf16.mxu0 %v374_v0  ;;  %v369_v5 = vld [vmem:[%s477_s4] sm:$0xff]   ;;  %342 = vmatprep.subr.bf16.mxu1 %v374_v0  ;;  %v373_v23 = vld [vmem:[%s481_s7 + $0x8] sm:$0xff]  }
   0x5   :  { %v34_v9 = vld [vmem:[%s479_s1] sm:$0xf] }
   0x6   :  { %v305_v10 = vld [vmem:[%s480_s3] ss:$0 sm:$0xff] }
   0x7   :  { %335 = vmatpush3.bf16.msra.mxu0 %v367_v2  ;;  %343 = vmatpush3.bf16.msra.mxu1 %v126_v7  ;;  %v372_v22 = vld [vmem:[%s481_s7] sm:$0xff]  }
   0x8   :  { %348 = vmatprep.subr.bf16.mxu0 %v374_v0  ;;  %356 = vmatprep.subr.bf16.mxu1 %v374_v0  ;;  %v315_v25 = vld [vmem:[%s482_s6] ss:$0 sm:$0xff] }
   0x9   :  { %v316_v33 = vld [vmem:[%s483_s8] ss:$0 sm:$0xff] }
   0xa   :  { %337 = vmatmul.mubr.msk.bf16.vlgmr.msra.gmra.mrb[0].mxu0 %vm58_vm1, %v33_v4  ;;  %345 = vmatmul.mubr.msk.bf16.vlgmr.msra.gmra.mrb[0].mxu1 %vm120_vm3, %v34_v9 }
   0xb   :  { %349 = vmatpush3.bf16.msra.mxu0 %v369_v5  ;;  %352 = vmatprep.mubr.msk.bf16.mxu0 %vm375_vm0, %v374_v0 }
   0xc   :  { %350 = vmatprep.subr.bf16.mxu0 %v374_v0  ;;  %360 = vmatprep.mubr.msk.bf16.mxu1 %vm375_vm0, %v374_v0 }
   0xd   :  { %357 = vmatpush3.bf16.msra.mxu1 %v372_v22 }
   0xe   :  { %358 = vmatprep.subr.bf16.mxu1 %v374_v0 }
   0xf   :  { %351 = vmatpush3.bf16.msra.mxu0 %v371_v8 }
  0x11   :  { %359 = vmatpush3.bf16.msra.mxu1 %v373_v23 }
  0xdd   :  { %v96_v11 = vpop.f32.mrb[0].mxu0  ;;  %v162_v18 = vpop.f32.mrb[0].mxu1 }
  0xde   :  { %v97_v12 = vadd.f32 %v305_v10, %v96_v11  ;;  %v338_v13 = vpop.f32.mrb[1].mxu0  ;;  %v346_v19 = vpop.f32.mrb[1].mxu1 }
  0xdf   :  { %v99_v14 = vpop.f32.mrb[2].mxu0  ;;  %v165_v20 = vpop.f32.mrb[2].mxu1 }
  0xe0   :  { %v102_v15 = vmax.f32 %v97_v12, 0.0  ;;  %v339_v16 = vpop.f32.mrb[3].mxu0  ;;  %v347_v21 = vpop.f32.mrb[3].mxu1 }
  0xe2   :  { %v103_v17 = vpack.c.bf16 %v102_v15, %v102_v15 }
  0xe4   :  { %353 = vmatmul.mubr.msk.bf16.vlgmr.msra.gmra.mrb[4].mxu0 %vm58_vm1, %v103_v17 }
 0x1b7   :  { %v217_v24 = vpop.f32.mrb[4].mxu0 }
 0x1b8   :  { %v218_v26 = vadd.f32 %v217_v24, %v162_v18  ;;  %v354_v27 = vpop.f32.mrb[5].mxu0 }
 0x1b9   :  { %v220_v28 = vpop.f32.mrb[6].mxu0 }
 0x1ba   :  { %v230_v29 = vadd.f32 %v315_v25, %v218_v26  ;;  %v355_v30 = vpop.f32.mrb[7].mxu0 }
 0x1bc   :  { %v231_v31 = vmax.f32 %v230_v29, 0.0 }
 0x1be   :  { %v232_v32 = vpack.c.bf16 %v231_v31, %v231_v31 }
 0x1c0   :  { %361 = vmatmul.mubr.msk.bf16.vlgmr.msra.gmra.mrb[4].mxu1 %vm58_vm1, %v232_v32 }
 0x293   :  { %v293_v34 = vpop.f32.mrb[4].mxu1 }
 0x294   :  { %v294_v35 = vadd.f32 %v316_v33, %v293_v34  ;;  %v362_v36 = vpop.f32.mrb[5].mxu1 }
 0x295   :  { %v296_v37 = vpop.f32.mrb[6].mxu1 }
 0x296   :  { %300 = vst.msk [vmem:[%s484_s9] sm:$0xff] %vm299_vm4, %v294_v35  ;;  %v363_v38 = vpop.f32.mrb[7].mxu1 }

</bundles_post_ra>
